<compile_context>
chip_gen: v6e
topology: v6e:2x2x1
jax: 0.10.0
libtpu: 0.0.40
codegen_flags: <defaults>
</compile_context>

<pallas_src>
import jax
import jax.numpy as jnp
from jax.experimental import pallas as pl
from jax.experimental.pallas import tpu as pltpu


# ----------------------------- kernel body -----------------------------

def _swish_kernel(x_ref, o_ref):
    x = x_ref[...]
    xf = x.astype(jnp.float32)          # f32 sigmoid path (v5e: no bf16 VPU/EUP)
    o_ref[...] = (xf * jax.nn.sigmoid(xf)).astype(o_ref.dtype)


# --------------------------- per-chip dispatch --------------------------

def _chip_config():
    """Return (target_tile_bytes, vmem_limit_bytes_or_None, dim_semantics)."""
    kind = ""
    try:
        kind = jax.devices()[0].device_kind.lower()
    except Exception:
        pass
    if "7" in kind:
        # v7x: 2 TCs/chip, 3.2 TB/s HBM, 64 MiB physical VMEM per TC.
        core_parallel = getattr(pltpu, "CORE_PARALLEL", "parallel")
        return 8 << 20, 48 << 20, (core_parallel,)
    if "v6" in kind:
        # v6e: 32 MiB scoped default; 4 MiB tile x 4 buffers = 16 MiB -> fits.
        return 4 << 20, None, ("parallel",)
    # v5e / unknown: 2 MiB tile -> 8 MiB of double-buffered VMEM < 16 MiB scoped.
    return 2 << 20, None, ("parallel",)


def _sublane_packing(dtype):
    # 8 sublanes for 4-byte, 16 for 2-byte, 32 for 1-byte dtypes.
    itemsize = jnp.dtype(dtype).itemsize
    return max(8, 8 * (4 // max(1, itemsize)))


# ----------------------- 2-D lane-dense pallas call ----------------------

def _swish_pallas_2d(x2, target_tile_bytes, vmem_limit, dim_semantics):
    rows, cols = x2.shape
    dtype = x2.dtype
    itemsize = jnp.dtype(dtype).itemsize
    sub = _sublane_packing(dtype)

    # Constant tile BYTES: row count adapts to cols and dtype width.
    tr = (target_tile_bytes // (cols * itemsize)) // sub * sub
    tr = max(tr, sub)
    if tr >= rows:
        tr = rows                       # single full-extent block (no alignment req.)

    grid_rows = pl.cdiv(rows, tr)       # ragged last block is masked by Pallas
    grid = (grid_rows,)

    # CORE_PARALLEL only pays off with >=2 blocks to split across TCs.
    if grid_rows < 2:
        dim_semantics = ("parallel",)

    n = rows * cols
    cost = pl.CostEstimate(
        flops=4 * n,
        transcendentals=n,
        bytes_accessed=2 * n * itemsize,
    )

    return pl.pallas_call(
        _swish_kernel,
        out_shape=jax.ShapeDtypeStruct((rows, cols), dtype),
        grid_spec=pltpu.PrefetchScalarGridSpec(
            num_scalar_prefetch=0,
            grid=grid,
            in_specs=[pl.BlockSpec((tr, cols), lambda i: (i, 0))],
            out_specs=pl.BlockSpec((tr, cols), lambda i: (i, 0)),
        ),
        compiler_params=pltpu.CompilerParams(
            dimension_semantics=dim_semantics,
            vmem_limit_bytes=vmem_limit,
        ),
        cost_estimate=cost,
    )(x2)


# -------------------------------- wrapper --------------------------------

def swish(x, *, min_pallas_elems=1 << 17, force_pallas=False):
    """Elementwise Swish (x * sigmoid(x)). Any shape, same shape/dtype out."""
    orig_shape = x.shape
    dtype = x.dtype
    n = x.size
    if n == 0:
        return x

    # Small-input fast path: Pallas launch + DMA setup dominates; XLA fuses
    # x*sigmoid(x) into a single HBM pass anyway.
    if n < min_pallas_elems and not force_pallas:
        xf = x.astype(jnp.float32)
        return (xf * jax.nn.sigmoid(xf)).astype(dtype)

    target_tile_bytes, vmem_limit, dim_semantics = _chip_config()
    flat = x.reshape(-1)

    # Lane-dense column width that divides N exactly -> no padding, no tail.
    cols = None
    for c in (1024, 512, 256, 128):
        if n % c == 0:
            cols = c
            break

    if cols is not None:
        out2 = _swish_pallas_2d(
            flat.reshape(n // cols, cols),
            target_tile_bytes, vmem_limit, dim_semantics)
        return out2.reshape(orig_shape)

    # Ragged case (rare for NN activations): kernel on the 128-aligned bulk,
    # plain JAX on the <128-element tail.  No jnp.pad / output slice.
    bulk = (n // 128) * 128
    if bulk == 0:
        xf = flat.astype(jnp.float32)
        return (xf * jax.nn.sigmoid(xf)).astype(dtype).reshape(orig_shape)
    for c in (1024, 512, 256, 128):
        if bulk % c == 0:
            cols = c
            break
    bulk_out = _swish_pallas_2d(
        flat[:bulk].reshape(bulk // cols, cols),
        target_tile_bytes, vmem_limit, dim_semantics).reshape(-1)
    tail = flat[bulk:].astype(jnp.float32)
    tail_out = (tail * jax.nn.sigmoid(tail)).astype(dtype)
    return jnp.concatenate([bulk_out, tail_out]).reshape(orig_shape)


# --------------------------------- demo ----------------------------------

if __name__ == "__main__":
    key = jax.random.PRNGKey(0)

    # NCHW-style activation consistent with the SIREN/conv usage: (2, 4, 16, 16).
    x_small = jax.random.normal(key, (2, 4, 16, 16), dtype=jnp.float32)

    # 1) Exercise the Pallas kernel on the small demo input.
    y_small = swish(x_small, force_pallas=True)
    jax.block_until_ready(y_small)
    ref_small = x_small * jax.nn.sigmoid(x_small)
    assert y_small.shape == x_small.shape and y_small.dtype == x_small.dtype
    assert jnp.max(jnp.abs(y_small - ref_small)) < 1e-6

    # 2) Default path on the small input (fast path, pure JAX).
    y_fast = swish(x_small)
    jax.block_until_ready(y_fast)
    assert jnp.max(jnp.abs(y_fast - ref_small)) < 1e-6

    # 3) Larger activation that naturally takes the Pallas path.
    x_big = jax.random.normal(jax.random.PRNGKey(1), (8, 16, 64, 64),
                              dtype=jnp.float32)
    y_big = swish(x_big)
    jax.block_until_ready(y_big)
    ref_big = x_big * jax.nn.sigmoid(x_big)
    assert y_big.shape == x_big.shape and y_big.dtype == x_big.dtype
    assert jnp.max(jnp.abs(y_big - ref_big)) < 1e-6

    print("KERNEL_OK")
</pallas_src>

<mosaic_0001>
module attributes {stable_mosaic.version = 11 : i64} {
  func.func @_swish_kernel(%arg0: i32, %arg1: memref<2x1024xf32, #tpu.memory_space<vmem>>, %arg2: memref<2x1024xf32, #tpu.memory_space<vmem>>) attributes {dimension_semantics = [#tpu.dimension_semantics<parallel>], iteration_bounds = array<i64: 1>, scalar_prefetch = 0 : i64, scratch_operands = 0 : i64, tpu.core_type = #tpu.core_type<tc>, window_params = [{transform_indices = @transform_0, window_bounds = array<i64: 2, 1024>}, {transform_indices = @transform_1, window_bounds = array<i64: 2, 1024>}]} {
    %c0 = arith.constant 0 : index
    %c0_0 = arith.constant 0 : index
    %0 = vector.load %arg1[%c0, %c0_0] : memref<2x1024xf32, #tpu.memory_space<vmem>>, vector<2x1024xf32>
    %1 = arith.negf %0 : vector<2x1024xf32>
    %2 = math.exp %1 : vector<2x1024xf32>
    %cst = arith.constant 1.000000e+00 : f32
    %3 = vector.broadcast %cst : f32 to vector<2x1024xf32>
    %4 = arith.addf %3, %2 : vector<2x1024xf32>
    %5 = arith.divf %3, %4 : vector<2x1024xf32>
    %6 = arith.mulf %0, %5 : vector<2x1024xf32>
    %c0_1 = arith.constant 0 : index
    %c0_2 = arith.constant 0 : index
    %7 = vector.load %arg2[%c0_1, %c0_2] : memref<2x1024xf32, #tpu.memory_space<vmem>>, vector<2x1024xf32>
    tpu.vector_store %arg2[%c0_1, %c0_2], %6 {strides = array<i32>} : memref<2x1024xf32, #tpu.memory_space<vmem>>, vector<2x1024xf32>,
    return
  }
  func.func @transform_0(%arg0: i32) -> (i32, i32) {
    %c0_i32 = arith.constant 0 : i32
    %c0_i32_0 = arith.constant 0 : i32
    return %arg0, %c0_i32 : i32, i32
  }
  func.func @transform_1(%arg0: i32) -> (i32, i32) {
    %c0_i32 = arith.constant 0 : i32
    %c0_i32_0 = arith.constant 0 : i32
    return %arg0, %c0_i32 : i32, i32
  }
}

</mosaic_0001>

<bundles_post_ra>
// kernel: tpu_custom_call.1
= control target key start
LH: loop header
LB: loop body
LE: loop exit
PB: predicated region body
PF: predicated region fallthrough
CT: control target
= control target key end

     0   :  { %6 = vsyncpa [#allocation3], 0  ;;  %s128_s0 = inlined_call_operand.hbm [shape: f32[2,1024], index: 0, kind: input, shape index: {}]   ;;  %s129_s1 = inlined_call_operand.hbm [shape: f32[2,1024], index: 1, kind: output, shape index: {}]  }
   0x1   :  { %7 = vsyncpa [#allocation4], 0  ;;  %s110_s6 = smov [#allocation2]  }
   0x2   :  { %s14_s7 = sshll.u32 %s110_s6, 4  ;;  %s15_s7 = int_to_ptr.vmem [resolvable:$true] %s14_s7 }
   0x3   :  { %s74_s8 = scalar_lea.vmem %s15_s7, 256  ;;  %p79_p1 = scmp.lt.s32.totalorder %s15_s7, %s15_s7 }
   0x4   :  { %p75_p0 = scmp.ne.s32.totalorder %s15_s7, %s74_s8  ;;  %p80_p2 = scmp.lt.s32.totalorder %s74_s8, %s74_s8 }
   0x6   :  { %p81_p3 = por %p80_p2, %p79_p1 }
   0x8   :  { %p82_p4 = pnand %p81_p3, %p75_p0 }
   0xa   :  { %85 = shalt.err (!%p82_p4)
}
   0xb   :  { %17 = dma.hbm_to_vmem [thread:$0]  %s128_s0, 256, %s15_s7, [#allocation3]  }
   0xc   :  { %106 = dma.done.wait [#allocation3], 256  }
   0xd   :  { %107 = vsyncadd [#allocation3], 4294967040  ;;  %v21_v0 = vld [vmem:[#allocation2] sm:$0xff]  ;;  %v22_v1 = vld [vmem:[#allocation2 + $0x8] sm:$0xff]  ;;  %s111_s11 = smov [#allocation5]  }
   0xe   :  { %v54_v2 = vmul.f32 -1.442695, %v21_v0  ;;  %v55_v3 = vmul.f32 -1.442695, %v22_v1  ;;  %s45_s12 = sshll.u32 %s111_s11, 4  ;;  %s46_s12 = int_to_ptr.vmem [resolvable:$true] %s45_s12 }
   0xf   :  { %s86_s0 = scalar_lea.vmem %s46_s12, 256  ;;  %p91_p6 = scmp.lt.s32.totalorder %s46_s12, %s46_s12 }
  0x10   :  { %58 = vpow2.f32 %v54_v2  ;;  %p87_p5 = scmp.ne.s32.totalorder %s46_s12, %s86_s0  ;;  %p92_p7 = scmp.lt.s32.totalorder %s86_s0, %s86_s0 }
  0x11   :  { %60 = vpow2.f32 %v55_v3 }
  0x12   :  { %p93_p8 = por %p92_p7, %p91_p6 }
  0x14   :  { %p94_p9 = pnand %p93_p8, %p87_p5 }
  0x1d   :  { %v59_v4 = vpop.eup %58 }
  0x1e   :  { %v61_v5 = vpop.eup %60  ;;  %v29_v6 = vadd.f32 1.0, %v59_v4 }
  0x1f   :  { %v30_v7 = vadd.f32 1.0, %v61_v5 }
  0x20   :  { %62 = vrcp.f32 %v29_v6 }
  0x21   :  { %64 = vrcp.f32 %v30_v7 }
  0x2d   :  { %v63_v8 = vpop.eup %62 }
  0x2e   :  { %v65_v9 = vpop.eup %64  ;;  %v35_v10 = vmul.f32 %v63_v8, %v21_v0 }
  0x2f   :  { %v36_v11 = vmul.f32 %v65_v9, %v22_v1 }
  0x30   :  { %37 = vst [vmem:[#allocation5] sm:$0xff] %v35_v10 }
  0x31   :  { %38 = vst [vmem:[#allocation5 + $0x8] sm:$0xff] %v36_v11 }
  0x32   :  { %97 = shalt.err (!%p94_p9)
}
  0x33   :  { %48 = dma.vmem_to_hbm [thread:$0]  %s46_s12, 256, %s129_s1, [#allocation4]  }
  0x34   :  { %108 = dma.done.wait [#allocation4], 256  }
  0x35   :  { %109 = vsyncadd [#allocation4], 4294967040 }
  0x36   :  { %52 = vsyncpa [#allocation3], 1 }
  0x37   :  { %53 = vsyncpa [#allocation4], 1 }

</bundles_post_ra>
